<compile_context>
chip_gen: v7x
topology: tpu7x:2x2x1
jax: 0.10.0
libtpu: 0.0.40
codegen_flags: <defaults>
</compile_context>

<pallas_src>
import functools

import jax
import jax.numpy as jnp
from jax import lax
from jax.experimental import pallas as pl
from jax.experimental.pallas import tpu as pltpu

ALPHA = 0.25
GAMMA = 2.0               # hard-wired as an explicit square in the kernel (gamma == 2)

_LANES = 128
_CHUNK_ROWS = 256         # in-kernel streaming chunk (keeps live VMEM temps small)
_EXP_NEG100 = 3.783506e-44  # exp(-100): pt floor matching nn.BCELoss's -100 log clamp


def _round_up(x, m):
    return ((x + m - 1) // m) * m


def _focal_loss_kernel(x_ref, t_ref, o_ref, *, chunk_rows, n_chunks, tile_rows,
                       valid_rows, n_cols, need_mask, binary_targets):
    acc = jnp.zeros((8, n_cols), jnp.float32)
    tile_row0 = pl.program_id(0) * tile_rows

    for c in range(n_chunks):                      # static unrolled chunk loop
        r0 = c * chunk_rows                        # static offset -> zero-cost ref view
        p = x_ref[r0:r0 + chunk_rows, :].astype(jnp.float32)
        t = t_ref[r0:r0 + chunk_rows, :]

        if binary_targets:
            # 1 transcendental / element; exactly the BCE formulation for t in {0,1}.
            q = jnp.where(t > 0.5, p, 1.0 - p)
            bce = jnp.minimum(-jnp.log(q), jnp.float32(100.0))
            pt = jnp.maximum(q, jnp.float32(_EXP_NEG100))
        else:
            tf = t.astype(jnp.float32)
            # nn.BCELoss clamps each log term at -100.  Keep the clamp INSIDE the
            # multiply so 0 * (-inf) never appears.
            log_p = jnp.maximum(jnp.log(p), jnp.float32(-100.0))
            log_1mp = jnp.maximum(jnp.log(1.0 - p), jnp.float32(-100.0))
            bce = -(tf * log_p + (1.0 - tf) * log_1mp)
            pt = jnp.exp(-bce)

        w = 1.0 - pt
        f = ALPHA * (w * w) * bce                  # gamma == 2 -> explicit square

        if need_mask:
            # Mask rows past the end of the (unpadded) input; where() is a select so
            # NaN/Inf from garbage overhang rows cannot leak into the sum.
            rows = (tile_row0 + r0
                    + lax.broadcasted_iota(jnp.int32, (chunk_rows, n_cols), 0))
            f = jnp.where(rows < valid_rows, f, jnp.float32(0.0))

        # (chunk_rows, cols) -> (8, cols): layout-preserving split of the leading dim,
        # pure VPU vreg adds (no XLU); only an (8, cols) value stays live across chunks.
        acc = acc + jnp.sum(f.reshape(chunk_rows // 8, 8, n_cols), axis=0)

    o_ref[...] = acc


def focal_loss(inputs, targets, *, tile_rows=4096, binary_targets=True,
               reduction="mean"):
    """Focal loss matching the PyTorch module.

    inputs: probabilities in (0,1) (f32 or bf16); targets: labels (f32 or bf16).
    binary_targets=True uses the 1-transcendental fast path (valid for t in {0,1});
    set False for soft / smoothed labels.
    """
    assert inputs.shape == targets.shape
    if reduction not in ("mean", "sum"):
        # TODO(synk): reduction='none' (per-element output) not implemented in Pallas.
        raise NotImplementedError("reduction must be 'mean' or 'sum'")

    total = int(inputs.size)

    # Free (metadata-only) 2-D views -- no padding, no concatenate, no relayout copy.
    if total % _LANES == 0:
        x2 = inputs.reshape(-1, _LANES)            # lane-dense fast layout
        t2 = targets.reshape(-1, _LANES)
    elif inputs.ndim >= 2:
        x2 = inputs.reshape(-1, inputs.shape[-1])  # ragged last dim handled by Mosaic
        t2 = targets.reshape(-1, targets.shape[-1])
    else:
        x2 = inputs.reshape(1, -1)
        t2 = targets.reshape(1, -1)
    rows, cols = x2.shape

    # Tile selection: multiple of 16 (safe for f32 and packed bf16 sublane tiling).
    r16 = _round_up(rows, 16)
    if r16 <= _CHUNK_ROWS:
        tr = r16
        chunk = tr
    else:
        tr = min(_round_up(tile_rows, _CHUNK_ROWS), _round_up(rows, _CHUNK_ROWS))
        chunk = _CHUNK_ROWS
    n_chunks = tr // chunk
    num_tiles = pl.cdiv(rows, tr)
    need_mask = (num_tiles * tr) != rows

    kernel = functools.partial(
        _focal_loss_kernel,
        chunk_rows=chunk, n_chunks=n_chunks, tile_rows=tr,
        valid_rows=rows, n_cols=cols, need_mask=need_mask,
        binary_targets=binary_targets)

    bytes_in = (x2.size * x2.dtype.itemsize) + (t2.size * t2.dtype.itemsize)
    cost = pl.CostEstimate(
        flops=12 * total,
        transcendentals=(1 if binary_targets else 3) * total,
        bytes_accessed=bytes_in + num_tiles * 8 * cols * 4,
    )

    partials = pl.pallas_call(
        kernel,
        out_shape=jax.ShapeDtypeStruct((num_tiles * 8, cols), jnp.float32),
        grid_spec=pltpu.PrefetchScalarGridSpec(
            num_scalar_prefetch=0,
            grid=(num_tiles,),
            in_specs=[
                pl.BlockSpec((tr, cols), lambda i: (i, 0)),
                pl.BlockSpec((tr, cols), lambda i: (i, 0)),
            ],
            out_specs=pl.BlockSpec((8, cols), lambda i: (i, 0)),
        ),
        compiler_params=pltpu.CompilerParams(
            # No carried accumulator -> independent grid steps. On v7x, if profiling
            # shows the single axis is not split across the two TensorCores, switch
            # to pltpu.CORE_PARALLEL (kept as plain "parallel" here for portability).
            dimension_semantics=("parallel",),
            vmem_limit_bytes=32 * 1024 * 1024,
        ),
        cost_estimate=cost,
    )(x2, t2)

    s = jnp.sum(partials)                          # tiny epilogue reduce in XLA
    if reduction == "sum":
        return s
    return s * jnp.float32(1.0 / total)            # mean over the ORIGINAL count


def focal_loss_ref(inputs, targets):
    p = inputs.astype(jnp.float32)
    t = targets.astype(jnp.float32)
    log_p = jnp.maximum(jnp.log(p), -100.0)
    log_1mp = jnp.maximum(jnp.log(1.0 - p), -100.0)
    bce = -(t * log_p + (1.0 - t) * log_1mp)
    pt = jnp.exp(-bce)
    return jnp.mean(ALPHA * (1.0 - pt) ** GAMMA * bce)


if __name__ == "__main__":
    key = jax.random.PRNGKey(0)
    k1, k2, k3, k4, k5, k6 = jax.random.split(key, 6)

    # Case 1: lane-aligned shape, binary bf16 targets, fast (1-log) path.
    N, D = 16, 128
    p1 = jax.nn.sigmoid(jax.random.normal(k1, (N, D), dtype=jnp.float32))
    t1 = (jax.random.uniform(k2, (N, D)) < 0.1).astype(jnp.bfloat16)
    loss1 = jax.block_until_ready(focal_loss(p1, t1, binary_targets=True))
    ref1 = focal_loss_ref(p1, t1)
    assert jnp.allclose(loss1, ref1, rtol=1e-4, atol=1e-6), (loss1, ref1)

    # Case 2: non-aligned shape (no padding copy; in-kernel row masking),
    # general soft-label path in f32.
    N2, D2 = 13, 37
    p2 = jax.nn.sigmoid(jax.random.normal(k3, (N2, D2), dtype=jnp.float32))
    t2 = jax.random.uniform(k4, (N2, D2), dtype=jnp.float32)   # soft labels
    loss2 = jax.block_until_ready(focal_loss(p2, t2, binary_targets=False))
    ref2 = focal_loss_ref(p2, t2)
    assert jnp.allclose(loss2, ref2, rtol=1e-4, atol=1e-6), (loss2, ref2)

    # Case 3: multi-tile, multi-chunk, ragged last tile (masked), binary targets.
    N3, D3 = 600, 128
    p3 = jax.nn.sigmoid(jax.random.normal(k5, (N3, D3), dtype=jnp.float32))
    t3 = (jax.random.uniform(k6, (N3, D3)) < 0.1).astype(jnp.bfloat16)
    loss3 = jax.block_until_ready(focal_loss(p3, t3, binary_targets=True,
                                             tile_rows=512))
    ref3 = focal_loss_ref(p3, t3)
    assert jnp.allclose(loss3, ref3, rtol=1e-4, atol=1e-6), (loss3, ref3)

    print("KERNEL_OK")
</pallas_src>

<mosaic_0001>
module attributes {stable_mosaic.version = 11 : i64} {
  func.func @_focal_loss_kernel(%arg0: i32, %arg1: memref<16x128xf32, #tpu.memory_space<vmem>>, %arg2: memref<16x128xbf16, #tpu.memory_space<vmem>>, %arg3: memref<8x128xf32, #tpu.memory_space<vmem>>) attributes {dimension_semantics = [#tpu.dimension_semantics<parallel>], iteration_bounds = array<i64: 1>, scalar_prefetch = 0 : i64, scratch_operands = 0 : i64, tpu.core_type = #tpu.core_type<tc>, window_params = [{transform_indices = @transform_0, window_bounds = array<i64: 16, 128>}, {transform_indices = @transform_1, window_bounds = array<i64: 16, 128>}, {transform_indices = @transform_2, window_bounds = array<i64: 8, 128>}]} {
    %cst = arith.constant 0.000000e+00 : f32
    %0 = vector.broadcast %cst : f32 to vector<8x128xf32>
    %c0 = arith.constant 0 : index
    %c0_0 = arith.constant 0 : index
    %1 = vector.load %arg1[%c0, %c0_0] : memref<16x128xf32, #tpu.memory_space<vmem>>, vector<16x128xf32>
    %c0_1 = arith.constant 0 : index
    %c0_2 = arith.constant 0 : index
    %2 = vector.load %arg2[%c0_1, %c0_2] : memref<16x128xbf16, #tpu.memory_space<vmem>>, vector<16x128xbf16>
    %cst_3 = arith.constant 5.000000e-01 : bf16
    %3 = vector.broadcast %cst_3 : bf16 to vector<16x128xbf16>
    %4 = arith.cmpf ogt, %2, %3 : vector<16x128xbf16>
    %cst_4 = arith.constant 1.000000e+00 : f32
    %5 = vector.broadcast %cst_4 : f32 to vector<16x128xf32>
    %6 = arith.subf %5, %1 : vector<16x128xf32>
    %7 = arith.select %4, %1, %6 : vector<16x128xi1>, vector<16x128xf32>
    %8 = math.log %7 : vector<16x128xf32>
    %cst_5 = arith.constant 0.000000e+00 : f32
    %9 = vector.broadcast %cst_5 : f32 to vector<16x128xf32>
    %10 = arith.subf %9, %8 : vector<16x128xf32>
    %cst_6 = arith.constant 1.000000e+02 : f32
    %11 = vector.broadcast %cst_6 : f32 to vector<16x128xf32>
    %12 = arith.minimumf %10, %11 : vector<16x128xf32>
    %cst_7 = arith.constant 3.783510e-44 : f32
    %13 = vector.broadcast %cst_7 : f32 to vector<16x128xf32>
    %14 = arith.maximumf %7, %13 : vector<16x128xf32>
    %cst_8 = arith.constant 1.000000e+00 : f32
    %15 = vector.broadcast %cst_8 : f32 to vector<16x128xf32>
    %16 = arith.subf %15, %14 : vector<16x128xf32>
    %17 = arith.mulf %16, %16 : vector<16x128xf32>
    %cst_9 = arith.constant 2.500000e-01 : f32
    %18 = vector.broadcast %cst_9 : f32 to vector<16x128xf32>
    %19 = arith.mulf %18, %17 : vector<16x128xf32>
    %20 = arith.mulf %19, %12 : vector<16x128xf32>
    %21 = vector.shape_cast %20 : vector<16x128xf32> to vector<2x8x128xf32>
    %cst_10 = arith.constant dense<0.000000e+00> : vector<8x128xf32>
    %22 = vector.multi_reduction <add>, %21, %cst_10 [0] : vector<2x8x128xf32> to vector<8x128xf32>
    %23 = arith.addf %0, %22 : vector<8x128xf32>
    %c0_11 = arith.constant 0 : index
    %c0_12 = arith.constant 0 : index
    %24 = vector.load %arg3[%c0_11, %c0_12] : memref<8x128xf32, #tpu.memory_space<vmem>>, vector<8x128xf32>
    tpu.vector_store %arg3[%c0_11, %c0_12], %23 {strides = array<i32>} : memref<8x128xf32, #tpu.memory_space<vmem>>, vector<8x128xf32>,
    return
  }
  func.func @transform_0(%arg0: i32) -> (i32, i32) {
    %c0_i32 = arith.constant 0 : i32
    %c0_i32_0 = arith.constant 0 : i32
    return %arg0, %c0_i32 : i32, i32
  }
  func.func @transform_1(%arg0: i32) -> (i32, i32) {
    %c0_i32 = arith.constant 0 : i32
    %c0_i32_0 = arith.constant 0 : i32
    return %arg0, %c0_i32 : i32, i32
  }
  func.func @transform_2(%arg0: i32) -> (i32, i32) {
    %c0_i32 = arith.constant 0 : i32
    %c0_i32_0 = arith.constant 0 : i32
    return %arg0, %c0_i32 : i32, i32
  }
}

</mosaic_0001>

<bundles_post_ra>
// kernel: tpu_custom_call.1
= control target key start
LH: loop header
LB: loop body
LE: loop exit
PB: predicated region body
PF: predicated region fallthrough
CT: control target
= control target key end

     0   :  { %7 = vsyncpa [#allocation3], 0  ;;  %s239_s0 = inlined_call_operand.hbm [shape: f32[16,128], index: 0, kind: input, shape index: {}]   ;;  %s240_s1 = inlined_call_operand.hbm [shape: bf16[16,128], index: 1, kind: input, shape index: {}]   ;;  %s241_s2 = inlined_call_operand.hbm [shape: f32[8,128], index: 2, kind: output, shape index: {}]  }
   0x1   :  { %8 = vsyncpa [#allocation6], 0 }
   0x2   :  { %9 = vsyncpa [#allocation4], 0  ;;  %s180_s9 = smov [#allocation2]   ;;  %s108_s13 = scalar_lea.hbm %s239_s0, 256 }
   0x3   :  { %s15_s10 = sshll.u32 %s180_s9, 4  ;;  %p109_p0 = scmp.ne.s32.totalorder %s239_s0, %s108_s13  ;;  %s16_s10 = int_to_ptr.vmem [resolvable:$true] %s15_s10 }
   0x4   :  { %p112_p1 = scmp.lt.u32.totalorder %s108_s13, %s239_s0 }
   0x6   :  { %p114_p2 = pnand %p112_p1, %p109_p0 }
   0x8   :  { %117 = shalt.err (!%p114_p2)
}
   0x9   :  { %s118_s18 = scalar_lea.vmem %s16_s10, 256  ;;  %p123_p4 = scmp.lt.s32.totalorder %s16_s10, %s16_s10 }
   0xa   :  { %p119_p3 = scmp.ne.s32.totalorder %s16_s10, %s118_s18  ;;  %p124_p5 = scmp.lt.s32.totalorder %s118_s18, %s118_s18 }
   0xc   :  { %p125_p6 = por %p124_p5, %p123_p4 }
   0xe   :  { %p126_p7 = pnand %p125_p6, %p119_p3 }
  0x10   :  { %129 = shalt.err (!%p126_p7)
}
  0x11   :  { %s181_s19 = smov 128   ;;  %s182_s20 = smov 8  }
  0x12   :  { %21 = dma.hbm_to_vmem [thread:$0]  %s239_s0, 256, %s16_s10, [#allocation3], %s181_s19, %s181_s19, %s182_s20  }
  0x13   :  { %s183_s23 = smov [#allocation5]   ;;  %s130_s27 = scalar_lea.hbm %s240_s1, 128 }
  0x14   :  { %s27_s24 = sshll.u32 %s183_s23, 4  ;;  %p131_p8 = scmp.ne.s32.totalorder %s240_s1, %s130_s27  ;;  %s28_s24 = int_to_ptr.vmem [resolvable:$true] %s27_s24 }
  0x15   :  { %p134_p9 = scmp.lt.u32.totalorder %s130_s27, %s240_s1 }
  0x17   :  { %p136_p10 = pnand %p134_p9, %p131_p8 }
  0x19   :  { %139 = shalt.err (!%p136_p10)
}
  0x1a   :  { %s140_s4 = scalar_lea.vmem %s28_s24, 128  ;;  %p145_p12 = scmp.lt.s32.totalorder %s28_s24, %s28_s24 }
  0x1b   :  { %p141_p11 = scmp.ne.s32.totalorder %s28_s24, %s140_s4  ;;  %p146_p13 = scmp.lt.s32.totalorder %s140_s4, %s140_s4 }
  0x1d   :  { %p147_p0 = por %p146_p13, %p145_p12 }
  0x1f   :  { %p148_p1 = pnand %p147_p0, %p141_p11 }
  0x21   :  { %151 = shalt.err (!%p148_p1)
}
  0x22   :  { %s184_s0 = smov 64   ;;  %s185_s5 = smov 4  }
  0x23   :  { %33 = dma.hbm_to_vmem [thread:$0]  %s240_s1, 128, %s28_s24, [#allocation6], %s184_s0, %s184_s0, %s185_s5  }
  0x24   :  { %174 = dma.done.wait [#allocation3], 256  }
  0x25   :  { %175 = vsyncadd [#allocation3], 4294967040 }
  0x26   :  { %176 = dma.done.wait [#allocation6], 128  }
  0x27   :  { %177 = vsyncadd [#allocation6], 4294967168  ;;  %v43_v0 = vld [vmem:[#allocation2] sm:$0xff]  ;;  %v44_v1 = vld [vmem:[#allocation2 + $0x8] sm:$0xff]  ;;  %v186_v5 = vmov 0   ;;  %s187_s1 = smov [#allocation7]  }
  0x28   :  { %v45_v2 = vld [vmem:[#allocation5] sm:$0xf]  ;;  %v46_v3 = vld [vmem:[#allocation5 + $0x4] sm:$0xf]  ;;  %v49_v4 = vsub.f32 1.0, %v43_v0  ;;  %v50_v7 = vsub.f32 1.0, %v44_v1 }
  0x29   :  { %vm47_vm0 = vcmp.gt.bf16.partialorder %v45_v2, 1056980736  ;;  %vm48_vm1 = vcmp.gt.bf16.partialorder %v46_v3, 1056980736  ;;  %s86_s8 = sshll.u32 %s187_s1, 4  ;;  %s87_s8 = int_to_ptr.vmem [resolvable:$true] %s86_s8 }
  0x2a   :  { %v51_v6 = vsel %vm47_vm0, 65537, %v186_v5  ;;  %v52_v8 = vsel %vm48_vm1, 65537, %v186_v5  ;;  %s152_s9 = scalar_lea.vmem %s87_s8, 128  ;;  %p157_p3 = scmp.lt.s32.totalorder %s87_s8, %s87_s8 }
  0x2b   :  { %v53_v9 = vunpack.c.l.b16 %v51_v6  ;;  %v54_v10 = vunpack.c.l.b16 %v52_v8  ;;  %p153_p2 = scmp.ne.s32.totalorder %s87_s8, %s152_s9  ;;  %p158_p4 = scmp.lt.s32.totalorder %s152_s9, %s152_s9 }
  0x2d   :  { %vm55_vm2 = vcmp.ne.s32.totalorder %v53_v9, 0  ;;  %vm56_vm3 = vcmp.ne.s32.totalorder %v54_v10, 0  ;;  %p159_p5 = por %p158_p4, %p157_p3 }
  0x2e   :  { %v57_v11 = vsel %vm55_vm2, %v43_v0, %v49_v4  ;;  %v58_v12 = vsel %vm56_vm3, %v44_v1, %v50_v7 }
  0x2f   :  { %104 = vlog2.f32 %v57_v11  ;;  %v67_v13 = vmax.f32 %v57_v11, 3.8e-44  ;;  %v68_v14 = vmax.f32 %v58_v12, 3.8e-44  ;;  %p160_p6 = pnand %p159_p5, %p153_p2 }
  0x30   :  { %106 = vlog2.f32 %v58_v12 }
  0x31   :  { %v69_v15 = vsub.f32 1.0, %v67_v13  ;;  %v70_v16 = vsub.f32 1.0, %v68_v14 }
  0x33   :  { %v71_v17 = vmul.f32 %v69_v15, %v69_v15  ;;  %v72_v19 = vmul.f32 %v70_v16, %v70_v16 }
  0x35   :  { %v73_v24 = vmul.f32 0.25, %v71_v17  ;;  %v74_v26 = vmul.f32 0.25, %v72_v19 }
  0x39   :  { %v105_v18 = vpop.eup %104 }
  0x3a   :  { %v107_v20 = vpop.eup %106  ;;  %v60_v21 = vmul.f32 0.6931472, %v105_v18 }
  0x3b   :  { %v62_v22 = vmul.f32 0.6931472, %v107_v20 }
  0x3c   :  { %v63_v23 = vsub.f32 0.0, %v60_v21 }
  0x3d   :  { %v64_v25 = vsub.f32 0.0, %v62_v22 }
  0x3e   :  { %v65_v27 = vmin.f32 %v63_v23, 100.0 }
  0x3f   :  { %v66_v28 = vmin.f32 %v64_v25, 100.0 }
  0x40   :  { %v75_v29 = vmul.f32 %v73_v24, %v65_v27 }
  0x41   :  { %v76_v30 = vmul.f32 %v74_v26, %v66_v28 }
  0x43   :  { %v77_v31 = vadd.f32 %v76_v30, %v75_v29 }
  0x45   :  { %79 = vst [vmem:[#allocation7] sm:$0xff] %v77_v31 }
  0x46   :  { %163 = shalt.err (!%p160_p6)
}
  0x47   :  { %s164_s12 = scalar_lea.hbm %s241_s2, 128 }
  0x48   :  { %p165_p7 = scmp.ne.s32.totalorder %s241_s2, %s164_s12  ;;  %p168_p8 = scmp.lt.u32.totalorder %s164_s12, %s241_s2 }
  0x4a   :  { %p170_p9 = pnand %p168_p8, %p165_p7 }
  0x4c   :  { %173 = shalt.err (!%p170_p9)
}
  0x4d   :  { %89 = dma.vmem_to_hbm [thread:$0]  %s87_s8, 128, %s241_s2, [#allocation4]  }
  0x4e   :  { %178 = dma.done.wait [#allocation4], 128  }
  0x4f   :  { %179 = vsyncadd [#allocation4], 4294967168 }
  0x50   :  { %93 = vsyncpa [#allocation3], 1 }
  0x51   :  { %94 = vsyncpa [#allocation6], 1 }
  0x52   :  { %95 = vsyncpa [#allocation4], 1 }

</bundles_post_ra>
